<compile_context>
chip_gen: v5e
topology: v5e:2x2
jax: 0.10.0
libtpu: 0.0.40
codegen_flags: <defaults>
</compile_context>

<pallas_src>
import functools

import jax
import jax.numpy as jnp
from jax.experimental import pallas as pl
from jax.experimental.pallas import tpu as pltpu

BN_EPS = 1e-5


def _round_up(n: int, m: int) -> int:
    return ((n + m - 1) // m) * m


def _encoder_kernel(x_ref, w_ref, p_ref, o_ref):
    # x_ref: (TB, D) f32   w_ref: (D, H) bf16   p_ref: (3, H) f32 = [bias; scale; shift]
    # Linear on the MXU: bf16 x bf16 -> f32 accumulation.
    h = jnp.dot(
        x_ref[...].astype(jnp.bfloat16),
        w_ref[...],
        preferred_element_type=jnp.float32,
    )
    bias = p_ref[0:1, :]
    scale = p_ref[1:2, :]
    shift = p_ref[2:3, :]
    # ReLU (Dropout is identity in eval mode).
    # TODO(synk): training-mode dropout (p=0.5) would need pltpu.prng_* and cannot
    # bitwise-match PyTorch's RNG stream, so eval semantics are implemented here.
    h = jnp.maximum(h + bias, 0.0)
    # BatchNorm1d (eval), pre-folded: scale = gamma * rsqrt(var + eps),
    # shift = beta - mean * scale.
    o_ref[...] = (h * scale + shift).astype(o_ref.dtype)


def prepare_encoder_params(w, b, gamma, beta, running_mean, running_var):
    """One-time (per weight set) preparation, kept OFF the per-call forward path.

    w: (D, H) f32 (PyTorch Linear weight transposed)
    b, gamma, beta, running_mean, running_var: (1, H) f32
    returns: (w_bf16 (D, H) bf16, params (3, H) f32)
    """
    scale = gamma * jax.lax.rsqrt(running_var + BN_EPS)          # (1, H)
    shift = beta - running_mean * scale                          # (1, H)
    params = jnp.concatenate(
        [b.reshape(1, -1), scale.reshape(1, -1), shift.reshape(1, -1)], axis=0
    ).astype(jnp.float32)                                        # (3, H)
    return w.astype(jnp.bfloat16), params


@functools.partial(jax.jit, static_argnames=("block_b",))
def encoder_forward(x, w_bf16, params, *, block_b=512):
    """Fused Linear + ReLU + (eval) Dropout + (eval) BatchNorm1d.

    x:      (B, D) f32
    w_bf16: (D, H) bf16   (from prepare_encoder_params)
    params: (3, H) f32    (packed [bias; scale; shift])
    returns: (B, H) f32
    """
    B, D = x.shape
    H = w_bf16.shape[1]

    # Batch tile: multiple of 8 sublanes, capped at block_b rows per grid step.
    TB = min(block_b, _round_up(B, 8))
    if B > 8:
        # Ensure >= 2 grid steps so the "parallel" axis really shards across the
        # two TensorCores on v7x (no-op on single-TC chips).
        TB = min(TB, _round_up(-(-B // 2), 8))
    TB = _round_up(TB, 8)
    grid = (pl.cdiv(B, TB),)   # ragged last block is masked by Pallas -> no x padding

    flops = 2 * B * D * H
    bytes_accessed = B * D * 4 + D * H * 2 + 3 * H * 4 + B * H * 4

    # TODO(synk): if D or H grow beyond a single VMEM-friendly tile, switch to the
    # canonical (M, N, K) grid with an f32 accumulator scratch and K marked "arbitrary".
    out = pl.pallas_call(
        _encoder_kernel,
        out_shape=jax.ShapeDtypeStruct((B, H), jnp.float32),
        grid=grid,
        in_specs=[
            pl.BlockSpec((TB, D), lambda i: (i, 0)),   # streamed per batch tile
            pl.BlockSpec((D, H), lambda i: (0, 0)),    # weight: VMEM-resident (constant block)
            pl.BlockSpec((3, H), lambda i: (0, 0)),    # packed bias/scale/shift
        ],
        out_specs=pl.BlockSpec((TB, H), lambda i: (i, 0)),
        compiler_params=pltpu.CompilerParams(
            dimension_semantics=("parallel",),          # megacore split on v7x
            vmem_limit_bytes=32 * 1024 * 1024,          # past v5e's 16 MiB scoped default
        ),
        cost_estimate=pl.CostEstimate(
            flops=flops, bytes_accessed=bytes_accessed, transcendentals=0
        ),
    )(x, w_bf16, params)

    return out


def reference_forward_f32(x, w, b, gamma, beta, running_mean, running_var):
    h = jnp.maximum(x @ w + b, 0.0)
    return (h - running_mean) * jax.lax.rsqrt(running_var + BN_EPS) * gamma + beta


def reference_forward_bf16(x, w, b, gamma, beta, running_mean, running_var):
    h = jnp.dot(x.astype(jnp.bfloat16), w.astype(jnp.bfloat16),
                preferred_element_type=jnp.float32)
    h = jnp.maximum(h + b, 0.0)
    scale = gamma * jax.lax.rsqrt(running_var + BN_EPS)
    shift = beta - running_mean * scale
    return h * scale + shift


if __name__ == "__main__":
    # Shapes consistent with Encoder(input_dimension=32, hidden_layer_size=64, hidden_layers=1)
    B, D, H = 8, 32, 64

    key = jax.random.PRNGKey(0)
    k_x, k_w, k_b, k_g, k_beta, k_m, k_v = jax.random.split(key, 7)

    x = jax.random.normal(k_x, (B, D), dtype=jnp.float32)

    # PyTorch Linear weight is (H, D); we store W^T = (D, H).
    bound = 1.0 / jnp.sqrt(jnp.float32(D))
    w = jax.random.uniform(k_w, (D, H), minval=-bound, maxval=bound, dtype=jnp.float32)
    b = jax.random.uniform(k_b, (1, H), minval=-bound, maxval=bound, dtype=jnp.float32)

    # BatchNorm1d affine params + running stats, perturbed so BN math is exercised.
    gamma = 1.0 + 0.1 * jax.random.normal(k_g, (1, H), dtype=jnp.float32)
    beta = 0.1 * jax.random.normal(k_beta, (1, H), dtype=jnp.float32)
    running_mean = 0.1 * jax.random.normal(k_m, (1, H), dtype=jnp.float32)
    running_var = 1.0 + 0.1 * jax.random.uniform(k_v, (1, H), dtype=jnp.float32)

    # One-time weight preparation (off the per-call forward path).
    w_bf16, params = prepare_encoder_params(w, b, gamma, beta, running_mean, running_var)
    w_bf16 = jax.block_until_ready(w_bf16)
    params = jax.block_until_ready(params)

    out = encoder_forward(x, w_bf16, params)
    out = jax.block_until_ready(out)
    assert out.shape == (B, H)

    # Exactness vs a bf16-matmul reference (same numerics as the kernel).
    ref_bf16 = reference_forward_bf16(x, w, b, gamma, beta, running_mean, running_var)
    assert jnp.allclose(out, ref_bf16, atol=1e-4, rtol=1e-4), "mismatch vs bf16-matmul reference"

    # Accuracy vs the full-f32 reference (bf16 MXU inputs => looser tolerance).
    ref_f32 = reference_forward_f32(x, w, b, gamma, beta, running_mean, running_var)
    assert jnp.allclose(out, ref_f32, atol=3e-2, rtol=3e-2), "mismatch vs f32 reference"

    print("KERNEL_OK")
</pallas_src>

<mosaic_0001>
module attributes {stable_mosaic.version = 11 : i64} {
  func.func @_encoder_kernel(%arg0: i32, %arg1: memref<8x32xf32, #tpu.memory_space<vmem>>, %arg2: memref<32x64xbf16, #tpu.memory_space<vmem>>, %arg3: memref<3x64xf32, #tpu.memory_space<vmem>>, %arg4: memref<8x64xf32, #tpu.memory_space<vmem>>) attributes {dimension_semantics = [#tpu.dimension_semantics<parallel>], iteration_bounds = array<i64: 1>, scalar_prefetch = 0 : i64, scratch_operands = 0 : i64, tpu.core_type = #tpu.core_type<tc>, window_params = [{transform_indices = @transform_0, window_bounds = array<i64: 8, 32>}, {pipeline_mode = #tpu.pipeline_mode<synchronous>, transform_indices = @transform_1, window_bounds = array<i64: 32, 64>}, {pipeline_mode = #tpu.pipeline_mode<synchronous>, transform_indices = @transform_2, window_bounds = array<i64: 3, 64>}, {transform_indices = @transform_3, window_bounds = array<i64: 8, 64>}]} {
    %c0 = arith.constant 0 : index
    %c0_0 = arith.constant 0 : index
    %0 = vector.load %arg1[%c0, %c0_0] : memref<8x32xf32, #tpu.memory_space<vmem>>, vector<8x32xf32>
    %1 = arith.truncf %0 : vector<8x32xf32> to vector<8x32xbf16>
    %c0_1 = arith.constant 0 : index
    %c0_2 = arith.constant 0 : index
    %2 = vector.load %arg2[%c0_1, %c0_2] : memref<32x64xbf16, #tpu.memory_space<vmem>>, vector<32x64xbf16>
    %cst = arith.constant dense<0.000000e+00> : vector<8x64xf32>
    %3 = tpu.matmul %1, %2, %cst {dimension_numbers = #tpu.dot_dimension_numbers<[1], [0], [0], [1], [0, 0, 1, 1], [], []>} : vector<8x32xbf16>, vector<32x64xbf16>, vector<8x64xf32> -> vector<8x64xf32>
    %c0_3 = arith.constant 0 : index
    %c0_4 = arith.constant 0 : index
    %4 = vector.load %arg3[%c0_3, %c0_4] : memref<3x64xf32, #tpu.memory_space<vmem>>, vector<1x64xf32>
    %c1 = arith.constant 1 : index
    %c0_5 = arith.constant 0 : index
    %5 = vector.load %arg3[%c1, %c0_5] : memref<3x64xf32, #tpu.memory_space<vmem>>, vector<1x64xf32>
    %c2 = arith.constant 2 : index
    %c0_6 = arith.constant 0 : index
    %6 = vector.load %arg3[%c2, %c0_6] : memref<3x64xf32, #tpu.memory_space<vmem>>, vector<1x64xf32>
    %7 = vector.broadcast %4 : vector<1x64xf32> to vector<8x64xf32>
    %8 = arith.addf %3, %7 : vector<8x64xf32>
    %cst_7 = arith.constant 0.000000e+00 : f32
    %9 = vector.broadcast %cst_7 : f32 to vector<8x64xf32>
    %10 = arith.maximumf %8, %9 : vector<8x64xf32>
    %11 = vector.broadcast %5 : vector<1x64xf32> to vector<8x64xf32>
    %12 = arith.mulf %10, %11 : vector<8x64xf32>
    %13 = vector.broadcast %6 : vector<1x64xf32> to vector<8x64xf32>
    %14 = arith.addf %12, %13 : vector<8x64xf32>
    %c0_8 = arith.constant 0 : index
    %c0_9 = arith.constant 0 : index
    %15 = vector.load %arg4[%c0_8, %c0_9] : memref<8x64xf32, #tpu.memory_space<vmem>>, vector<8x64xf32>
    tpu.vector_store %arg4[%c0_8, %c0_9], %14 {strides = array<i32>} : memref<8x64xf32, #tpu.memory_space<vmem>>, vector<8x64xf32>,
    return
  }
  func.func @transform_0(%arg0: i32) -> (i32, i32) {
    %c0_i32 = arith.constant 0 : i32
    %c0_i32_0 = arith.constant 0 : i32
    return %arg0, %c0_i32 : i32, i32
  }
  func.func @transform_1(%arg0: i32) -> (i32, i32) {
    %c0_i32 = arith.constant 0 : i32
    %c0_i32_0 = arith.constant 0 : i32
    %c0_i32_1 = arith.constant 0 : i32
    return %c0_i32, %c0_i32_0 : i32, i32
  }
  func.func @transform_2(%arg0: i32) -> (i32, i32) {
    %c0_i32 = arith.constant 0 : i32
    %c0_i32_0 = arith.constant 0 : i32
    %c0_i32_1 = arith.constant 0 : i32
    return %c0_i32, %c0_i32_0 : i32, i32
  }
  func.func @transform_3(%arg0: i32) -> (i32, i32) {
    %c0_i32 = arith.constant 0 : i32
    %c0_i32_0 = arith.constant 0 : i32
    return %arg0, %c0_i32 : i32, i32
  }
}

</mosaic_0001>

<bundles_post_ra>
// kernel: encoder_forward.1
= control target key start
LH: loop header
LB: loop body
LE: loop exit
PB: predicated region body
PF: predicated region fallthrough
CT: control target
= control target key end

     0   :  { %8 = vsyncpa [#allocation3], 0  ;;  %s283_s0 = inlined_call_operand.hbm [shape: f32[8,32], index: 0, kind: input, shape index: {}]   ;;  %s284_s1 = inlined_call_operand.hbm [shape: bf16[32,64], index: 1, kind: input, shape index: {}]   ;;  %s285_s2 = inlined_call_operand.hbm [shape: f32[3,64], index: 2, kind: input, shape index: {}]   ;;  %s286_s3 = inlined_call_operand.hbm [shape: f32[8,64], index: 3, kind: output, shape index: {}]  }
   0x1   :  { %9 = vsyncpa [#allocation6], 0  ;;  %s26_s14 = sshll.u32 %s284_s1, 4  ;;  %s27_s14 = int_to_ptr.hbm [resolvable:$true] %s26_s14 }
   0x2   :  { %10 = vsyncpa [#allocation4], 0  ;;  %s245_s15 = smov [#allocation5]   ;;  %s16_s19 = sshll.u32 %s283_s0, 4  ;;  %s17_s19 = int_to_ptr.hbm [resolvable:$true] %s16_s19 }
   0x3   :  { %s28_s16 = sshll.u32 %s245_s15, 4  ;;  %s246_s20 = smov 64   ;;  %s29_s16 = int_to_ptr.vmem [resolvable:$true] %s28_s16 }
   0x4   :  { %s247_s21 = smov 4   ;;  %s248_s22 = smov [#allocation2]  }
   0x5   :  { %34 = dma.hbm_to_vmem [thread:$0]  %s27_s14, 256, %s29_s16, [#allocation6], %s246_s20, %s246_s20, %s247_s21  }
   0x6   :  { %s18_s23 = sshll.u32 %s248_s22, 4  ;;  %s40_s26 = sshll.u32 %s285_s2, 4  ;;  %s19_s23 = int_to_ptr.vmem [resolvable:$true] %s18_s23  ;;  %s41_s26 = int_to_ptr.hbm [resolvable:$true] %s40_s26 }
   0x7   :  { %21 = dma.hbm_to_vmem [thread:$0]  %s17_s19, 128, %s19_s23, [#allocation3]  }
   0x8   :  { %s249_s1 = smov [#allocation7]  }
   0x9   :  { %s42_s27 = sshll.u32 %s249_s1, 4  ;;  %s43_s27 = int_to_ptr.vmem [resolvable:$true] %s42_s27 }
   0xa   :  { %45 = dma.hbm_to_vmem [thread:$0]  %s41_s26, 64, %s43_s27, [#allocation6]  }
   0xb   :  { %239 = dma.done.wait [#allocation3], 128  }
   0xc   :  { %240 = vsyncadd [#allocation3], 4294967168 }
   0xd   :  { %241 = dma.done.wait [#allocation6], 320  }
   0xe   :  { %242 = vsyncadd [#allocation6], 4294966976  ;;  %v133_v0 = vld [vmem:[#allocation5 + $0x8] sm:$0xff]  ;;  %v132_v1 = vld [vmem:[#allocation5] sm:$0xff]  ;;  %vm81_vm0 = vcmask 261120   ;;  %s250_s0 = smov [#allocation8]  }
   0xf   :  { %91 = vmatpush.bf16.msra.mxu0 %v133_v0  ;;  %v59_v2 = vld [vmem:[#allocation2] sm:$0xff]  ;;  %v140_v4 = vld [vmem:[#allocation7] ss:$0 sm:$0xff]  ;;  %v141_v7 = vld [vmem:[#allocation7 + $0x1] ss:$0 sm:$0xff]  ;;  %s110_s2 = sshll.u32 %s250_s0, 4  ;;  %s111_s2 = int_to_ptr.vmem [resolvable:$true] %s110_s2 }
  0x10   :  { %v60_v3 = vpack.c.bf16 %v59_v2, %v59_v2  ;;  %v142_v9 = vld [vmem:[#allocation7 + $0x2] ss:$0 sm:$0xff]  ;;  %s112_s30 = sshll.u32 %s286_s3, 4  ;;  %vm103_vm1 = vcmask 523264   ;;  %s113_s30 = int_to_ptr.hbm [resolvable:$true] %s112_s30 }
  0x13   :  { %92 = vmatpush.bf16.msra.mxu0 %v132_v1 }
  0x16   :  { %131 = vmatmul.msk.bf16.vlgmr.msra.gmra.mxu0 %vm81_vm0, %v60_v3 }
  0x93   :  { %v94_v5 = vpop.f32.mrf.mxu0 }
  0x94   :  { %v95_v6 = vadd.f32 %v140_v4, %v94_v5 }
  0x96   :  { %v98_v8 = vmax.f32 %v95_v6, 0.0 }
  0x98   :  { %v100_v10 = vmul.f32 %v141_v7, %v98_v8 }
  0x9a   :  { %v102_v11 = vadd.f32 %v142_v9, %v100_v10 }
  0x9b   :  { %v96_v12 = vpop.f32.mrf.mxu0 }
  0x9c   :  { %104 = vst.msk [vmem:[#allocation8] sm:$0xff] %vm103_vm1, %v102_v11 }
  0x9d   :  { %115 = dma.vmem_to_hbm [thread:$0]  %s111_s2, 128, %s113_s30, [#allocation4]  }
  0x9e   :  { %243 = dma.done.wait [#allocation4], 128  }
  0x9f   :  { %244 = vsyncadd [#allocation4], 4294967168 }
  0xa0   :  { %120 = vsyncpa [#allocation3], 1 }
  0xa1   :  { %121 = vsyncpa [#allocation6], 1 }
  0xa2   :  { %122 = vsyncpa [#allocation4], 1 }

</bundles_post_ra>
